<compile_context>
chip_gen: v7x
topology: tpu7x:2x2x1
jax: 0.10.0
libtpu: 0.0.40
codegen_flags: <defaults>
</compile_context>

<pallas_src>
import jax
import jax.numpy as jnp
from jax.experimental import pallas as pl
from jax.experimental.pallas import tpu as pltpu


def patch_embedding(x, w_conv, b_conv, cls_token, positions, patch_size,
                    *, out_dtype=jnp.bfloat16):
    """PatchEmbedding forward.

    x         : (B, C, H, W) f32, NCHW (PyTorch layout)
    w_conv    : (E, C, P, P) f32, Conv2d weight (stride = kernel = P)
    b_conv    : (E,)         f32, Conv2d bias
    cls_token : (1, 1, E)    f32
    positions : (N+1, E)     f32
    returns   : (B, N+1, E)  out_dtype  (bf16 by default, f32 available)
    """
    B, C, H, W = x.shape
    P = patch_size
    E = w_conv.shape[0]
    assert H % P == 0 and W % P == 0, "H and W must be divisible by patch_size"
    nh, nw = H // P, W // P
    N = nh * nw
    K = C * P * P

    # --- host-side prep ------------------------------------------------------
    # Patchify (space-to-depth) + flatten to (B*N, K); feature order (c, ph, pw).
    # The final .reshape(B*N, K) merge is layout-preserving (free).
    patches = (x.reshape(B, C, nh, P, nw, P)
                .transpose(0, 2, 4, 1, 3, 5)
                .reshape(B * N, K)).astype(jnp.bfloat16)
    w_mat = w_conv.reshape(E, K).T.astype(jnp.bfloat16)            # (K, E)

    # Fold bias + cls token into the positional table (done once, on host).
    pos = positions.reshape(N + 1, E).astype(jnp.float32)
    row0 = pos[0:1, :] + cls_token.reshape(1, E).astype(jnp.float32)
    rest = pos[1:, :] + b_conv.reshape(1, E).astype(jnp.float32)
    pos_fused = jnp.concatenate([row0, rest], axis=0).astype(jnp.bfloat16)

    # Pack TB images per grid step.  TB must divide B and keep the patches
    # block's second-minor dim (TB*N) a multiple of 8 (else fall back to TB=B,
    # which equals the full array dim and is always legal).
    TB = next((d for d in (4, 2, 1) if B % d == 0 and (d * N) % 8 == 0), B)

    def kernel(patch_ref, w_ref, pos_ref, o_ref):
        # patch_ref: (TB*N, K) bf16 ; w_ref: (K, E) bf16
        # pos_ref  : (N+1, E)  bf16 ; o_ref: (TB, N+1, E) out_dtype
        proj = jnp.dot(patch_ref[...], w_ref[...],
                       preferred_element_type=jnp.float32)         # (TB*N, E) f32
        cls_row = pos_ref[0:1, :].astype(o_ref.dtype)               # hoisted
        pos_rest = pos_ref[1:, :].astype(jnp.float32)               # hoisted
        for t in range(TB):                                         # static unroll
            o_ref[t, 0:1, :] = cls_row
            o_ref[t, 1:, :] = (proj[t * N:(t + 1) * N, :]
                               + pos_rest).astype(o_ref.dtype)

    invariant = dict(pipeline_mode=pl.Buffered(1))   # grid-invariant operands

    out_itemsize = jnp.dtype(out_dtype).itemsize
    bytes_accessed = (patches.size * 2 + w_mat.size * 2 + pos_fused.size * 2
                      + B * (N + 1) * E * out_itemsize)

    out = pl.pallas_call(
        kernel,
        out_shape=jax.ShapeDtypeStruct((B, N + 1, E), out_dtype),
        grid_spec=pltpu.PrefetchScalarGridSpec(
            num_scalar_prefetch=0,
            grid=(B // TB,),
            in_specs=[
                pl.BlockSpec((TB * N, K), lambda i: (i, 0)),                 # patches
                pl.BlockSpec((K, E), lambda i: (0, 0), **invariant),         # weight
                pl.BlockSpec((N + 1, E), lambda i: (0, 0), **invariant),     # pos(+bias,+cls)
            ],
            out_specs=pl.BlockSpec((TB, N + 1, E), lambda i: (i, 0, 0)),
        ),
        compiler_params=pltpu.CompilerParams(
            dimension_semantics=("parallel",),
            vmem_limit_bytes=64 * 1024 * 1024),
        cost_estimate=pl.CostEstimate(
            flops=2 * B * N * K * E,
            transcendentals=0,
            bytes_accessed=int(bytes_accessed)),
    )(patches, w_mat, pos_fused)
    return out


def _reference(x, w_conv, b_conv, cls_token, positions):
    # Pure-JAX reference mirroring the PyTorch forward (NCHW conv, stride=kernel).
    y = jax.lax.conv_general_dilated(
        x, w_conv,
        window_strides=(w_conv.shape[2], w_conv.shape[3]),
        padding="VALID",
        dimension_numbers=("NCHW", "OIHW", "NCHW"),
        precision=jax.lax.Precision.HIGHEST,
    ) + b_conv[None, :, None, None]                                 # (B, E, h, w)
    B, E, h, w = y.shape
    y = y.transpose(0, 2, 3, 1).reshape(B, h * w, E)                # b (h w) e
    cls = jnp.broadcast_to(cls_token.reshape(1, 1, E), (B, 1, E))
    y = jnp.concatenate([cls, y], axis=1)
    return y + positions[None, :, :]


if __name__ == "__main__":
    # Small, module-consistent shapes; E=128 keeps the embed dim lane-dense.
    # B=8 with TB=4 gives a 2-step grid, exercising the pipelined index maps.
    B, C, IMG, P, E = 8, 3, 32, 8, 128
    N = (IMG // P) ** 2

    key = jax.random.PRNGKey(0)
    k_x, k_w, k_b, k_cls, k_pos = jax.random.split(key, 5)

    x = jax.random.normal(k_x, (B, C, IMG, IMG), dtype=jnp.float32)
    w_conv = jax.random.normal(k_w, (E, C, P, P), dtype=jnp.float32) * 0.02
    b_conv = jax.random.normal(k_b, (E,), dtype=jnp.float32) * 0.02
    cls_token = jax.random.normal(k_cls, (1, 1, E), dtype=jnp.float32)
    positions = jax.random.uniform(k_pos, (N + 1, E), dtype=jnp.float32)

    out = patch_embedding(x, w_conv, b_conv, cls_token, positions, P)
    out = jax.block_until_ready(out)

    ref = _reference(x, w_conv, b_conv, cls_token, positions)
    assert out.shape == (B, N + 1, E)
    assert out.dtype == jnp.bfloat16
    # bf16 matmul operands / bf16 pos / bf16 output vs. f32 reference.
    out_f32 = out.astype(jnp.float32)
    max_err = float(jnp.max(jnp.abs(out_f32 - ref)))
    assert jnp.allclose(out_f32, ref, atol=3e-2, rtol=3e-2), max_err

    print("KERNEL_OK")
</pallas_src>

<mosaic_0001>
module attributes {stable_mosaic.version = 11 : i64} {
  func.func @kernel(%arg0: i32, %arg1: memref<64x192xbf16, #tpu.memory_space<vmem>>, %arg2: memref<192x128xbf16, #tpu.memory_space<vmem>>, %arg3: memref<17x128xbf16, #tpu.memory_space<vmem>>, %arg4: memref<4x17x128xbf16, #tpu.memory_space<vmem>>) attributes {dimension_semantics = [#tpu.dimension_semantics<parallel>], iteration_bounds = array<i64: 2>, scalar_prefetch = 0 : i64, scratch_operands = 0 : i64, tpu.core_type = #tpu.core_type<tc>, window_params = [{transform_indices = @transform_0, window_bounds = array<i64: 64, 192>}, {pipeline_mode = #tpu.pipeline_mode<synchronous>, transform_indices = @transform_1, window_bounds = array<i64: 192, 128>}, {pipeline_mode = #tpu.pipeline_mode<synchronous>, transform_indices = @transform_2, window_bounds = array<i64: 17, 128>}, {transform_indices = @transform_3, window_bounds = array<i64: 4, 17, 128>}]} {
    %c0 = arith.constant 0 : index
    %c0_0 = arith.constant 0 : index
    %0 = vector.load %arg1[%c0, %c0_0] : memref<64x192xbf16, #tpu.memory_space<vmem>>, vector<64x192xbf16>
    %c0_1 = arith.constant 0 : index
    %c0_2 = arith.constant 0 : index
    %1 = vector.load %arg2[%c0_1, %c0_2] : memref<192x128xbf16, #tpu.memory_space<vmem>>, vector<192x128xbf16>
    %cst = arith.constant dense<0.000000e+00> : vector<64x128xf32>
    %2 = tpu.matmul %0, %1, %cst {dimension_numbers = #tpu.dot_dimension_numbers<[1], [0], [0], [1], [0, 0, 1, 1], [], []>} : vector<64x192xbf16>, vector<192x128xbf16>, vector<64x128xf32> -> vector<64x128xf32>
    %c0_3 = arith.constant 0 : index
    %c0_4 = arith.constant 0 : index
    %3 = vector.load %arg3[%c0_3, %c0_4] : memref<17x128xbf16, #tpu.memory_space<vmem>>, vector<1x128xbf16>
    %c1 = arith.constant 1 : index
    %c0_5 = arith.constant 0 : index
    %4 = vector.load %arg3[%c1, %c0_5] : memref<17x128xbf16, #tpu.memory_space<vmem>>, vector<16x128xbf16>
    %5 = arith.extf %4 : vector<16x128xbf16> to vector<16x128xf32>
    %c0_6 = arith.constant 0 : index
    %c0_7 = arith.constant 0 : index
    %c0_8 = arith.constant 0 : index
    %6 = vector.load %arg4[%c0_6, %c0_7, %c0_8] : memref<4x17x128xbf16, #tpu.memory_space<vmem>>, vector<1x1x128xbf16>
    %7 = vector.shape_cast %6 : vector<1x1x128xbf16> to vector<1x128xbf16>
    %8 = vector.shape_cast %3 : vector<1x128xbf16> to vector<1x1x128xbf16>
    tpu.vector_store %arg4[%c0_6, %c0_7, %c0_8], %8 {strides = array<i32>} : memref<4x17x128xbf16, #tpu.memory_space<vmem>>, vector<1x1x128xbf16>,
    %9 = vector.extract_strided_slice %2 {offsets = [0, 0], sizes = [16, 128], strides = [1, 1]} : vector<64x128xf32> to vector<16x128xf32>
    %10 = arith.addf %9, %5 : vector<16x128xf32>
    %11 = arith.truncf %10 : vector<16x128xf32> to vector<16x128xbf16>
    %c0_9 = arith.constant 0 : index
    %c1_10 = arith.constant 1 : index
    %c0_11 = arith.constant 0 : index
    %12 = vector.load %arg4[%c0_9, %c1_10, %c0_11] : memref<4x17x128xbf16, #tpu.memory_space<vmem>>, vector<1x16x128xbf16>
    %13 = vector.shape_cast %12 : vector<1x16x128xbf16> to vector<16x128xbf16>
    %14 = vector.shape_cast %11 : vector<16x128xbf16> to vector<1x16x128xbf16>
    tpu.vector_store %arg4[%c0_9, %c1_10, %c0_11], %14 {strides = array<i32>} : memref<4x17x128xbf16, #tpu.memory_space<vmem>>, vector<1x16x128xbf16>,
    %c1_12 = arith.constant 1 : index
    %c0_13 = arith.constant 0 : index
    %c0_14 = arith.constant 0 : index
    %15 = vector.load %arg4[%c1_12, %c0_13, %c0_14] : memref<4x17x128xbf16, #tpu.memory_space<vmem>>, vector<1x1x128xbf16>
    %16 = vector.shape_cast %15 : vector<1x1x128xbf16> to vector<1x128xbf16>
    %17 = vector.shape_cast %3 : vector<1x128xbf16> to vector<1x1x128xbf16>
    tpu.vector_store %arg4[%c1_12, %c0_13, %c0_14], %17 {strides = array<i32>} : memref<4x17x128xbf16, #tpu.memory_space<vmem>>, vector<1x1x128xbf16>,
    %18 = vector.extract_strided_slice %2 {offsets = [16, 0], sizes = [16, 128], strides = [1, 1]} : vector<64x128xf32> to vector<16x128xf32>
    %19 = arith.addf %18, %5 : vector<16x128xf32>
    %20 = arith.truncf %19 : vector<16x128xf32> to vector<16x128xbf16>
    %c1_15 = arith.constant 1 : index
    %c1_16 = arith.constant 1 : index
    %c0_17 = arith.constant 0 : index
    %21 = vector.load %arg4[%c1_15, %c1_16, %c0_17] : memref<4x17x128xbf16, #tpu.memory_space<vmem>>, vector<1x16x128xbf16>
    %22 = vector.shape_cast %21 : vector<1x16x128xbf16> to vector<16x128xbf16>
    %23 = vector.shape_cast %20 : vector<16x128xbf16> to vector<1x16x128xbf16>
    tpu.vector_store %arg4[%c1_15, %c1_16, %c0_17], %23 {strides = array<i32>} : memref<4x17x128xbf16, #tpu.memory_space<vmem>>, vector<1x16x128xbf16>,
    %c2 = arith.constant 2 : index
    %c0_18 = arith.constant 0 : index
    %c0_19 = arith.constant 0 : index
    %24 = vector.load %arg4[%c2, %c0_18, %c0_19] : memref<4x17x128xbf16, #tpu.memory_space<vmem>>, vector<1x1x128xbf16>
    %25 = vector.shape_cast %24 : vector<1x1x128xbf16> to vector<1x128xbf16>
    %26 = vector.shape_cast %3 : vector<1x128xbf16> to vector<1x1x128xbf16>
    tpu.vector_store %arg4[%c2, %c0_18, %c0_19], %26 {strides = array<i32>} : memref<4x17x128xbf16, #tpu.memory_space<vmem>>, vector<1x1x128xbf16>,
    %27 = vector.extract_strided_slice %2 {offsets = [32, 0], sizes = [16, 128], strides = [1, 1]} : vector<64x128xf32> to vector<16x128xf32>
    %28 = arith.addf %27, %5 : vector<16x128xf32>
    %29 = arith.truncf %28 : vector<16x128xf32> to vector<16x128xbf16>
    %c2_20 = arith.constant 2 : index
    %c1_21 = arith.constant 1 : index
    %c0_22 = arith.constant 0 : index
    %30 = vector.load %arg4[%c2_20, %c1_21, %c0_22] : memref<4x17x128xbf16, #tpu.memory_space<vmem>>, vector<1x16x128xbf16>
    %31 = vector.shape_cast %30 : vector<1x16x128xbf16> to vector<16x128xbf16>
    %32 = vector.shape_cast %29 : vector<16x128xbf16> to vector<1x16x128xbf16>
    tpu.vector_store %arg4[%c2_20, %c1_21, %c0_22], %32 {strides = array<i32>} : memref<4x17x128xbf16, #tpu.memory_space<vmem>>, vector<1x16x128xbf16>,
    %c3 = arith.constant 3 : index
    %c0_23 = arith.constant 0 : index
    %c0_24 = arith.constant 0 : index
    %33 = vector.load %arg4[%c3, %c0_23, %c0_24] : memref<4x17x128xbf16, #tpu.memory_space<vmem>>, vector<1x1x128xbf16>
    %34 = vector.shape_cast %33 : vector<1x1x128xbf16> to vector<1x128xbf16>
    %35 = vector.shape_cast %3 : vector<1x128xbf16> to vector<1x1x128xbf16>
    tpu.vector_store %arg4[%c3, %c0_23, %c0_24], %35 {strides = array<i32>} : memref<4x17x128xbf16, #tpu.memory_space<vmem>>, vector<1x1x128xbf16>,
    %36 = vector.extract_strided_slice %2 {offsets = [48, 0], sizes = [16, 128], strides = [1, 1]} : vector<64x128xf32> to vector<16x128xf32>
    %37 = arith.addf %36, %5 : vector<16x128xf32>
    %38 = arith.truncf %37 : vector<16x128xf32> to vector<16x128xbf16>
    %c3_25 = arith.constant 3 : index
    %c1_26 = arith.constant 1 : index
    %c0_27 = arith.constant 0 : index
    %39 = vector.load %arg4[%c3_25, %c1_26, %c0_27] : memref<4x17x128xbf16, #tpu.memory_space<vmem>>, vector<1x16x128xbf16>
    %40 = vector.shape_cast %39 : vector<1x16x128xbf16> to vector<16x128xbf16>
    %41 = vector.shape_cast %38 : vector<16x128xbf16> to vector<1x16x128xbf16>
    tpu.vector_store %arg4[%c3_25, %c1_26, %c0_27], %41 {strides = array<i32>} : memref<4x17x128xbf16, #tpu.memory_space<vmem>>, vector<1x16x128xbf16>,
    return
  }
  func.func @transform_0(%arg0: i32) -> (i32, i32) {
    %c0_i32 = arith.constant 0 : i32
    %c0_i32_0 = arith.constant 0 : i32
    return %arg0, %c0_i32 : i32, i32
  }
  func.func @transform_1(%arg0: i32) -> (i32, i32) {
    %c0_i32 = arith.constant 0 : i32
    %c0_i32_0 = arith.constant 0 : i32
    %c0_i32_1 = arith.constant 0 : i32
    return %c0_i32, %c0_i32_0 : i32, i32
  }
  func.func @transform_2(%arg0: i32) -> (i32, i32) {
    %c0_i32 = arith.constant 0 : i32
    %c0_i32_0 = arith.constant 0 : i32
    %c0_i32_1 = arith.constant 0 : i32
    return %c0_i32, %c0_i32_0 : i32, i32
  }
  func.func @transform_3(%arg0: i32) -> (i32, i32, i32) {
    %c0_i32 = arith.constant 0 : i32
    %c0_i32_0 = arith.constant 0 : i32
    %c0_i32_1 = arith.constant 0 : i32
    return %arg0, %c0_i32, %c0_i32_0 : i32, i32, i32
  }
}

</mosaic_0001>

<bundles_post_ra>
// kernel: tpu_custom_call.1
= control target key start
LH: loop header
LB: loop body
LE: loop exit
PB: predicated region body
PF: predicated region fallthrough
CT: control target
= control target key end

     0   :  { %8 = vsyncpa [#allocation3], 0  ;;  %s1453_s0 = inlined_call_operand.hbm [shape: bf16[128,192], index: 0, kind: input, shape index: {}]   ;;  %s1454_s1 = inlined_call_operand.hbm [shape: bf16[192,128], index: 1, kind: input, shape index: {}]   ;;  %s1455_s2 = inlined_call_operand.hbm [shape: bf16[17,128], index: 2, kind: input, shape index: {}]   ;;  %s1456_s3 = inlined_call_operand.hbm [shape: bf16[8,17,128], index: 3, kind: output, shape index: {}]  }
   0x1   :  { %10 = vsyncpa [#allocation3 + $0x1], 0 }
   0x2   :  { %11 = vsyncpa [#allocation6], 0 }
   0x3   :  { %12 = vsyncpa [#allocation4], 0 }
   0x4   :  { %14 = vsyncpa [#allocation4 + $0x1], 0  ;;  %s1126_s12 = smov 0   ;;  %s1128_s13 = smov 0  }
   0x5   :  { %s1130_s14 = smov 0   ;;  %s1132_s15 = smov 0  }
   0x6 LB: > { %s1147_s16 = sadd.s32 4294967295, %s1093_s15   ;;  %s728_s17 = sadd.s32 4294967294, %s1093_s15   ;;  %s1093_s15 = sphi %s1132_s15, %s1482_s15   ;;  %s1089_s14 = sphi %s1130_s14, %s1481_s14   ;;  %s1085_s13 = sphi %s1128_s13, %s1480_s13   ;;  %s1081_s12 = sphi %s1126_s12, %s1479_s12  }
   0x7   : > { %p40_p0 = scmp.ne.s32.totalorder %s1085_s13, %s1081_s12  ;;  %p1457_p1 = scmp.eq.s32.totalorder %s1147_s16, 0 }
   0x8   : > { %p112_p3 = scmp.eq.s32.totalorder %s728_s17, 1  ;;  %p729_p5 = scmp.ge.s32.totalorder %s1093_s15, 1 }
   0x9   : > { %p1156_p4 = por %p1457_p1, %p40_p0  ;;  %p119_p7 = scmp.lt.s32.totalorder %s1093_s15, 3 }
   0xa   : > { %p1161_p6 = por %p112_p3, %p40_p0  ;;  %s1095_s21 = smov [#allocation5]  }
   0xb   : > { %s1460_s18 = scalar_select %p1156_p4, 1, 0 }
   0xc   : > { %s1461_s19 = scalar_select %p1161_p6, 1, 0 }
   0xd   : > { %p1166_p8 = pnand %p729_p5, %p119_p7  ;;  %s131_s22 = sshll.u32 %s1095_s21, 4  ;;  %s1170_s22 = int_to_ptr.vmem [resolvable:$true] %s131_s22 }
   0xe   : > { %s1096_s24 = smov [#allocation7]   ;;  %s937_s28 = scalar_lea.hbm %s1454_s1, 1536 }
   0xf   : > { %p851_p9 = pneg %p1166_p8  ;;  %s144_s25 = sshll.u32 %s1096_s24, 4  ;;  %s1181_s25 = int_to_ptr.vmem [resolvable:$true] %s144_s25 }
  0x10   : > { %p938_p12 = scmp.ne.s32.totalorder %s1454_s1, %s937_s28  ;;  %p944_p5 = scmp.lt.u32.totalorder %s937_s28, %s1454_s1 }
  0x11   : > { %p1177_p11 = pnand %p851_p9, %p1457_p1 }
  0x13   : > { %p939_p13 = pneg %p1177_p11 }
  0x15   : > { %p940_p0 = pnand %p939_p13, %p938_p12 }
  0x17   : > { %p941_p3 = pneg %p940_p0 }
  0x19   : > { %p946_p7 = pnand %p944_p5, %p941_p3 }
  0x1b   : > { %949 = shalt.err (!%p946_p7)
}
  0x1c   : > { %s950_s6 = scalar_lea.vmem %s1170_s22, 1536  ;;  %p958_p2 = scmp.lt.s32.totalorder %s1170_s22, %s1170_s22 }
  0x1d   : > { %p951_p9 = scmp.ne.s32.totalorder %s1170_s22, %s950_s6  ;;  %p959_p12 = scmp.lt.s32.totalorder %s950_s6, %s950_s6 }
  0x1f   : > { %p953_p10 = pnand %p951_p9, %p939_p13  ;;  %p960_p0 = por %p959_p12, %p958_p2 }
  0x21   : > { %p954_p1 = pneg %p953_p10 }
  0x23   : > { %p961_p6 = pnand %p960_p0, %p954_p1 }
  0x25   : > { %964 = shalt.err (!%p961_p6)
}
  0x26   : > { %s1097_s7 = smov 64   ;;  %s1098_s8 = smov 4  }
  0x27   : > { %854 = dma.hbm_to_vmem [thread:$0]  (!%p1177_p11), %s1454_s1, 1536, %s1170_s22, [#allocation6], %s1097_s7, %s1097_s7, %s1098_s8  }
  0x28   : > { %s965_s21 = scalar_lea.hbm %s1455_s2, 192 }
  0x29   : > { %p966_p2 = scmp.ne.s32.totalorder %s1455_s2, %s965_s21  ;;  %p972_p10 = scmp.lt.u32.totalorder %s965_s21, %s1455_s2 }
  0x2b   : > { %p968_p1 = pnand %p966_p2, %p939_p13 }
  0x2d   : > { %p969_p6 = pneg %p968_p1 }
  0x2f   : > { %p974_p3 = pnand %p972_p10, %p969_p6 }
  0x31   : > { %977 = shalt.err (!%p974_p3)
}
  0x32   : > { %s978_s22 = scalar_lea.vmem %s1181_s25, 192  ;;  %p986_p12 = scmp.lt.s32.totalorder %s1181_s25, %s1181_s25 }
  0x33   : > { %p979_p5 = scmp.ne.s32.totalorder %s1181_s25, %s978_s22  ;;  %p987_p0 = scmp.lt.s32.totalorder %s978_s22, %s978_s22 }
  0x35   : > { %p981_p7 = pnand %p979_p5, %p939_p13  ;;  %p988_p2 = por %p987_p0, %p986_p12 }
  0x37   : > { %p982_p9 = pneg %p981_p7 }
  0x39   : > { %p989_p1 = pnand %p988_p2, %p982_p9 }
  0x3b   : > { %992 = shalt.err (!%p989_p1)
}
  0x3c   : > { %857 = dma.hbm_to_vmem [thread:$0]  (!%p1177_p11), %s1455_s2, 192, %s1181_s25, [#allocation6], %s1097_s7, %s1097_s7, %s1098_s8  }
  0x3d   : > { %s1236_s4 = sadd.s32 1, %s1093_s15   ;;  %s27_s23 = sadd.s32 1, %s1089_s14 }
  0x3e   : > { %s24_s5 = ssub.s32 %s1093_s15, %s1236_s4  ;;  %p34_p13 = scmp.ne.s32.totalorder %s1089_s14, %s1085_s13 }
  0x3f   : > { %p25_p6 = scmp.eq.s32.totalorder %s24_s5, 0  ;;  %p35_p10 = scmp.eq.s32.totalorder %s1093_s15, 0 }
  0x40   : > { %p1464_p3 = scmp.eq.s32.totalorder %s1147_s16, 1  ;;  %p868_p7 = scmp.lt.s32.totalorder %s1093_s15, 2 }
  0x41   : > { %s1252_s9 = scalar_select %p25_p6, %s1089_s14, %s27_s23  }
  0x42   : > { %p1246_p5 = por %p1464_p3, %p34_p13  ;;  %p36_p9 = por %p35_p10, %p34_p13 }
  0x43   : > { %s158_s10 = sand.u32 1, %s1089_s14   ;;  %s800_s25 = sshll.u32 %s1093_s15, 10 }
  0x44   : > { %s1465_s6 = scalar_select %p1246_p5, 1, 0 }
  0x45   : > { %s733_s11 = sshll.u32 %s158_s10, 6  ;;  %s1259_s17 = scalar_lea.hbm %s1453_s0, %s800_s25 }
  0x46   : > { %s162_s21 = scalar_lea.vmem [#allocation2], %s733_s11  ;;  %p1263_p11 = pnand %p868_p7, %p36_p9 }
  0x47   : > { %s170_s24 = sshll.u32 %s162_s21, 4  ;;  %s1267_s27 = scalar_lea.sflag [#allocation3], %s158_s10  ;;  %s1261_s24 = int_to_ptr.vmem [resolvable:$true] %s170_s24 }
  0x48   : > { %s993_s28 = scalar_lea.hbm %s1259_s17, 1024  ;;  %p995_p0 = pneg %p1263_p11 }
  0x49   : > { %p994_p12 = scmp.ne.s32.totalorder %s1259_s17, %s993_s28  ;;  %s998_s30 = scalar_lea.hbm %s1453_s0, 2048 }
  0x4a   : > { %p999_p13 = scmp.lt.u32.totalorder %s1259_s17, %s1453_s0  ;;  %p1000_p6 = scmp.lt.u32.totalorder %s998_s30, %s993_s28 }
  0x4b   : > { %p996_p2 = pnand %p995_p0, %p994_p12  ;;  %p1002_p3 = scmp.lt.u32.totalorder %s993_s28, %s1259_s17 }
  0x4c   : > { %p1001_p10 = por %p1000_p6, %p999_p13 }
  0x4d   : > { %p997_p1 = pneg %p996_p2 }
  0x4e   : > { %p1003_p7 = por %p1002_p3, %p1001_p10 }
  0x50   : > { %p1004_p9 = pnand %p1003_p7, %p997_p1 }
  0x52   : > { %1007 = shalt.err (!%p1004_p9)
}
  0x53   : > { %s1008_s10 = scalar_lea.vmem %s1261_s24, 1024  ;;  %s1099_s11 = smov [#allocation2]  }
  0x54   : > { %p1009_p12 = scmp.ne.s32.totalorder %s1261_s24, %s1008_s10  ;;  %s1013_s25 = sshll.u32 %s1099_s11, 4  ;;  %s1014_s25 = int_to_ptr.vmem [resolvable:$false] %s1013_s25 }
  0x55   : > { %s1015_s7 = scalar_lea.vmem %s1014_s25, 2048  ;;  %p1016_p4 = scmp.lt.s32.totalorder %s1261_s24, %s1014_s25 }
  0x56   : > { %p1011_p2 = pnand %p1009_p12, %p995_p0  ;;  %p1017_p13 = scmp.lt.s32.totalorder %s1015_s7, %s1008_s10 }
  0x58   : > { %p1012_p5 = pneg %p1011_p2  ;;  %p1018_p6 = por %p1017_p13, %p1016_p4 }
  0x5a   : > { %p1019_p10 = pnand %p1018_p6, %p1012_p5 }
  0x5c   : > { %1022 = shalt.err (!%p1019_p10)
}
  0x5d   : > { %s1100_s8 = smov 128   ;;  %s1101_s21 = smov 8  }
  0x5e   : > { %861 = dma.hbm_to_vmem [thread:$0]  (!%p1263_p11), %s1259_s17, 1024, %s1261_s24, %s1267_s27, %s1100_s8, %s1100_s8, %s1101_s21  }
  0x5f   : > { %182 = sbr.rel (%p1166_p8) target bundleno = 405 (0x195), region = 32  ;;  %s1298_s28 = sand.u32 (!%p1166_p8), 1, %s1085_s13  }
  0x60   : > { %s738_s22 = sshll.u32 (!%p1166_p8), %s1298_s28, 6  ;;  %s185_s29 = scalar_lea.sflag (!%p1166_p8), [#allocation3], %s1298_s28 }
  0x61   : > { %s1302_s30 = scalar_lea.vmem (!%p1166_p8), [#allocation2], %s738_s22  ;;  %p1467_p4 = scmp.ne.s32.totalorder (!%p1166_p8), %s1460_s18, 0 }
  0x66   : > { %1068 = dma.done.wait (%p1467_p4), %s185_s29, 1024  }
  0x67   : > { %1070 = vsyncadd (%p1467_p4), %s185_s29, 4294966272  ;;  %p1468_p5 = scmp.eq.s32.totalorder %s1147_s16, 0 }
  0x69   : > { %1072 = dma.done.wait (%p1468_p5), [#allocation6], 1728   ;;  %p1469_p8 = pmov %p1468_p5 }
  0x6a   : > { %v1102_v0 = vmov 0   ;;  %v913_v1 = vld [vmem:[#allocation5] sm:$0xff]   ;;  %v914_v2 = vld [vmem:[#allocation5 + $0x8] sm:$0xff]   ;;  %v915_v3 = vld [vmem:[#allocation5 + $0x10] sm:$0xff]   ;;  %vm362_vm0 = vcmask 523264   ;;  %s837_s18 = smul.u32 48, %s1298_s28 }
  0x6b   : > { %1074 = vsyncadd (%p1469_p8), [#allocation6], 4294965568  ;;  %375 = vmatprep.subr.bf16.mxu0 %v1102_v0  ;;  %813 = vmatprep.subr.bf16.mxu1 %v1102_v0  ;;  %v916_v4 = vld [vmem:[#allocation5 + $0x18] sm:$0xff]   ;;  %v927_v5 = vld [vmem:[%s1302_s30 + $0x4] ss:$8 sps:$4 sm:$0xff]   ;;  %vm447_vm1 = vcmask 1040384  }
  0x6c   : > { %376 = vmatpush1.bf16.msra.mxu0 %v913_v1  ;;  %825 = vmatpush1.bf16.msra.mxu1 %v913_v1  ;;  %v917_v6 = vld [vmem:[#allocation5 + $0x20] sm:$0xff]   ;;  %v918_v8 = vld [vmem:[#allocation5 + $0x28] sm:$0xff]   ;;  %v919_v9 = vld [vmem:[#allocation5 + $0x30] sm:$0xff]   ;;  %vm448_vm2 = vsmask.f32 256  ;;  %s1330_s20 = scalar_lea.vmem [#allocation8], %s837_s18 }
  0x6d   : > { %377 = vmatprep.subr.bf16.mxu0 %v1102_v0  ;;  %814 = vmatprep.subr.bf16.mxu1 %v1102_v0  ;;  %v930_v7 = vld [vmem:[%s1302_s30 + $0x24] ss:$8 sps:$4 sm:$0xff]   ;;  %v920_v10 = vld [vmem:[#allocation5 + $0x38] sm:$0xff]   ;;  %v923_v13 = vld [vmem:[#allocation5 + $0x50] sm:$0xff]   ;;  %vm456_vm4 = vcmask 1046528   ;;  %vm494_vm5 = vcmask 1043456  }
  0x6e   : > { %761 = vmatprep.mubr.msk.bf16.mxu0 %vm362_vm0, %v927_v5  ;;  %763 = vmatprep.mubr.msk.bf16.mxu1 %vm362_vm0, %v930_v7  ;;  %v921_v11 = vld [vmem:[#allocation5 + $0x40] sm:$0xff]   ;;  %v922_v12 = vld [vmem:[#allocation5 + $0x48] sm:$0xff]   ;;  %v924_v14 = vld [vmem:[#allocation5 + $0x58] sm:$0xff]   ;;  %vm495_vm6 = vsmask.f32 7938  ;;  %s838_s17 = smul.u32 768, %s1147_s16 }
  0x6f   : > { %v925_v15 = vld [vmem:[%s1302_s30] ss:$8 sps:$4 sm:$0xff]   ;;  %v931_v17 = vld [vmem:[%s1302_s30 + $0x14] ss:$8 sps:$4 sm:$0xff]   ;;  %v935_v19 = vld [vmem:[%s1302_s30 + $0x10] ss:$8 sps:$4 sm:$0xff]  }
  0x70   : > { %378 = vmatpush1.bf16.msra.mxu0 %v914_v2  ;;  %826 = vmatpush1.bf16.msra.mxu1 %v914_v2  ;;  %v928_v16 = vld [vmem:[%s1302_s30 + $0x20] ss:$8 sps:$4 sm:$0xff]   ;;  %v933_v18 = vld [vmem:[%s1302_s30 + $0x34] ss:$8 sps:$4 sm:$0xff]   ;;  %v936_v20 = vld [vmem:[%s1302_s30 + $0x30] ss:$8 sps:$4 sm:$0xff]   ;;  %s1389_s27 = scalar_lea.hbm %s1456_s3, %s838_s17 }
  0x71   : > { %379 = vmatprep.subr.bf16.mxu0 %v1102_v0  ;;  %815 = vmatprep.subr.bf16.mxu1 %v1102_v0  ;;  %v440_v21 = vld [vmem:[#allocation7] sm:$0x1]  ;;  %vm1326_vm3 = vmand %vm447_vm1, %vm448_vm2  ;;  %v450_v23 = vld [vmem:[%s1330_s20] sm:$0x1]  ;;  %vm472_vm7 = vsmask.f32 4368 }
  0x72   : > { %v776_v24 = vld [vmem:[%s1330_s20 + $0x18] sm:$0x1]  ;;  %v451_v25 = vsel %vm1326_vm3, %v440_v21, %v450_v23  ;;  %v767_v27 = vld [vmem:[%s1330_s20 + $0xc] sm:$0x1]  ;;  %v785_v28 = vld [vmem:[%s1330_s20 + $0x24] sm:$0x1] }
  0x73   : > { %v545_v26 = vsel %vm1326_vm3, %v440_v21, %v776_v24  ;;  %452 = vst [vmem:[%s1330_s20] sm:$0x1] %v451_v25  ;;  %v506_v29 = vsel %vm1326_vm3, %v440_v21, %v767_v27  ;;  %v584_v30 = vsel %vm1326_vm3, %v440_v21, %v785_v28  ;;  %v810_v31 = vld [vmem:[#allocation7] sm:$0xff]   ;;  %v443_v32 = vld [vmem:[#allocation7 + $0x8] sm:$0x1]  ;;  %vm1350_vm8 = vmand %vm494_vm5, %vm495_vm6  ;;  %s636_s24 = sshll.u32 %s1330_s20, 4  ;;  %s622_s23 = scalar_lea.sflag [#allocation4], %s1298_s28  ;;  %s1391_s24 = int_to_ptr.vmem [resolvable:$true] %s636_s24 }
  0x74   : > { %380 = vmatpush1.bf16.msra.mxu0 %v915_v3  ;;  %827 = vmatpush1.bf16.msra.mxu1 %v915_v3  ;;  %777 = vst [vmem:[%s1330_s20 + $0x18] sm:$0x1] %v545_v26  ;;  %768 = vst [vmem:[%s1330_s20 + $0xc] sm:$0x1] %v506_v29  ;;  %v811_v33 = vunpack.c.l.bf16 %v810_v31  ;;  %v812_v34 = vunpack.c.h.bf16 %v810_v31  ;;  %v446_v35 = vunpack.c.l.bf16 %v443_v32  ;;  %v501_v24 = vld [vmem:[%s1330_s20 + $0x8] sm:$0x1] }
  0x75   : > { %381 = vmatprep.subr.bf16.mxu0 %v1102_v0  ;;  %816 = vmatprep.subr.bf16.mxu1 %v1102_v0  ;;  %786 = vst [vmem:[%s1330_s20 + $0x24] sm:$0x1] %v584_v30  ;;  %vm1360_vm9 = vmor %vm448_vm2, %vm472_vm7  ;;  %v783_v25 = vld [vmem:[%s1330_s20 + $0x20] sm:$0x1]  ;;  %s1023_s5 = scalar_lea.vmem %s1391_s24, 768  ;;  %p1476_p0 = scmp.ne.s32.totalorder %s1465_s6, 0 }
  0x76   : > { %v457_v36 = vrot.slane %v811_v33, 1  ;;  %v458_v37 = vrot.slane %v812_v34, 1  ;;  %v460_v38 = vrot.slane %v446_v35, 1  ;;  %p1024_p11 = scmp.ne.s32.totalorder %s1391_s24, %s1023_s5  ;;  %s1103_s10 = smov [#allocation8]  }
  0x77   : > { %s1027_s11 = sshll.u32 %s1103_s10, 4  ;;  %s1028_s11 = int_to_ptr.vmem [resolvable:$false] %s1027_s11 }
  0x78   : > { %382 = vmatpush1.bf16.msra.mxu0 %v916_v4  ;;  %828 = vmatpush1.bf16.msra.mxu1 %v916_v4  ;;  %v459_v39 = vsel %vm456_vm4, %v457_v36, %v458_v37  ;;  %v461_v42 = vsel %vm456_vm4, %v458_v37, %v460_v38  ;;  %p1025_p1 = pnand %p1024_p11, %p1476_p0  ;;  %s1029_s25 = scalar_lea.vmem %s1028_s11, 1536 }
  0x79   : > { %383 = vmatprep.subr.bf16.mxu0 %v1102_v0  ;;  %817 = vmatprep.subr.bf16.mxu1 %v1102_v0  ;;  %p1030_p7 = scmp.lt.s32.totalorder %s1391_s24, %s1028_s11  ;;  %p1031_p9 = scmp.lt.s32.totalorder %s1029_s25, %s1023_s5 }
  0x7a   : > { %v497_v57 = vld [vmem:[%s1330_s20] sm:$0xf]  ;;  %p1026_p3 = pneg %p1025_p1 }
  0x7b   : > { %p1032_p12 = por %p1031_p9, %p1030_p7 }
  0x7c   : > { %384 = vmatpush1.bf16.msra.mxu0 %v917_v6  ;;  %829 = vmatpush1.bf16.msra.mxu1 %v917_v6 }
  0x7d   : > { %385 = vmatprep.subr.bf16.mxu0 %v1102_v0  ;;  %818 = vmatprep.subr.bf16.mxu1 %v1102_v0  ;;  %p1033_p2 = pnand %p1032_p12, %p1026_p3 }
  0x80   : > { %386 = vmatpush1.bf16.msra.mxu0 %v918_v8  ;;  %830 = vmatpush1.bf16.msra.mxu1 %v918_v8 }
  0x81   : > { %387 = vmatprep.subr.bf16.mxu0 %v1102_v0  ;;  %819 = vmatprep.subr.bf16.mxu1 %v1102_v0 }
  0x84   : > { %388 = vmatpush1.bf16.msra.mxu0 %v919_v9  ;;  %831 = vmatpush1.bf16.msra.mxu1 %v919_v9 }
  0x85   : > { %389 = vmatprep.subr.bf16.mxu0 %v1102_v0  ;;  %820 = vmatprep.subr.bf16.mxu1 %v1102_v0 }
  0x88   : > { %390 = vmatpush1.bf16.msra.mxu0 %v920_v10  ;;  %832 = vmatpush1.bf16.msra.mxu1 %v920_v10 }
  0x89   : > { %391 = vmatprep.subr.bf16.mxu0 %v1102_v0  ;;  %821 = vmatprep.subr.bf16.mxu1 %v1102_v0 }
  0x8c   : > { %392 = vmatpush1.bf16.msra.mxu0 %v921_v11  ;;  %833 = vmatpush1.bf16.msra.mxu1 %v921_v11 }
  0x8d   : > { %393 = vmatprep.subr.bf16.mxu0 %v1102_v0  ;;  %822 = vmatprep.subr.bf16.mxu1 %v1102_v0 }
  0x90   : > { %394 = vmatpush1.bf16.msra.mxu0 %v922_v12  ;;  %834 = vmatpush1.bf16.msra.mxu1 %v922_v12 }
  0x91   : > { %395 = vmatprep.subr.bf16.mxu0 %v1102_v0  ;;  %823 = vmatprep.subr.bf16.mxu1 %v1102_v0 }
  0x94   : > { %396 = vmatpush1.bf16.msra.mxu0 %v923_v13  ;;  %835 = vmatpush1.bf16.msra.mxu1 %v923_v13 }
  0x95   : > { %397 = vmatprep.subr.bf16.mxu0 %v1102_v0  ;;  %824 = vmatprep.subr.bf16.mxu1 %v1102_v0  ;;  %v780_v0 = vld [vmem:[%s1330_s20 + $0x18] sm:$0xf] }
  0x98   : > { %398 = vmatpush1.bf16.msra.mxu0 %v924_v14  ;;  %836 = vmatpush1.bf16.msra.mxu1 %v924_v14 }
  0x9b   : > { %408 = vmatmul.mubr.bf16.vlgmr.msra.gmra.mrb[0].mxu0 %v925_v15  ;;  %424 = vmatmul.mubr.bf16.vlgmr.msra.gmra.mrb[0].mxu1 %v928_v16 }
  0x9c   : > { %762 = vmatprep.mubr.msk.bf16.mxu0 %vm362_vm0, %v931_v17  ;;  %764 = vmatprep.mubr.msk.bf16.mxu1 %vm362_vm0, %v933_v18 }
  0xa3   : > { %416 = vmatmul.mubr.bf16.gmra.mrb[4].mxu0 %v935_v19  ;;  %432 = vmatmul.mubr.bf16.gmra.mrb[4].mxu1 %v936_v20 }
 0x16e   : > { %v409_v40 = vpop.f32.mrb[0].mxu0  ;;  %v425_v41 = vpop.f32.mrb[0].mxu1 }
 0x16f   : > { %v464_v43 = vadd.f32 %v459_v39, %v409_v40  ;;  %v547_v44 = vadd.f32 %v459_v39, %v425_v41  ;;  %v411_v45 = vpop.f32.mrb[1].mxu0  ;;  %v427_v46 = vpop.f32.mrb[1].mxu1 }
 0x170   : > { %v412_v47 = vpop.f32.mrb[2].mxu0  ;;  %v428_v48 = vpop.f32.mrb[2].mxu1  ;;  %v789_v45 = vld [vmem:[%s1330_s20 + $0x24] sm:$0xf] }
 0x171   : > { %v801_v49 = vpack.c.bf16 %v464_v43, %v464_v43  ;;  %v805_v50 = vpack.c.bf16 %v547_v44, %v547_v44  ;;  %v465_v51 = vadd.f32 %v461_v42, %v412_v47  ;;  %v548_v52 = vadd.f32 %v461_v42, %v428_v48  ;;  %v414_v53 = vpop.f32.mrb[3].mxu0  ;;  %v430_v54 = vpop.f32.mrb[3].mxu1  ;;  %v771_v44 = vld [vmem:[%s1330_s20 + $0xc] sm:$0xf] }
 0x172   : > { %v774_v54 = vld [vmem:[%s1330_s20 + $0x14] sm:$0x1] }
 0x173   : > { %v475_v55 = vshrl.u32 %v801_v49, 16  ;;  %v556_v56 = vshrl.u32 %v805_v50, 16  ;;  %v802_v58 = vpack.c.bf16 %v465_v51, %v465_v51  ;;  %v806_v59 = vpack.c.bf16 %v548_v52, %v548_v52 }
 0x174   : > { %v478_v61 = vshll.u32 %v801_v49, 16  ;;  %v559_v63 = vshll.u32 %v805_v50, 16 }
 0x175   : > { %v477_v60 = vrot.slane %v475_v55, 7  ;;  %v558_v62 = vrot.slane %v556_v56, 7  ;;  %v483_v2 = vshrl.u32 %v802_v58, 16  ;;  %v486_v3 = vshll.u32 %v802_v58, 16 }
 0x176   : > { %v564_v4 = vshrl.u32 %v806_v59, 16  ;;  %v567_v5 = vshll.u32 %v806_v59, 16  ;;  %v417_v6 = vpop.f32.mrb[4].mxu0  ;;  %v433_v7 = vpop.f32.mrb[4].mxu1 }
 0x177   : > { %v480_v8 = vor.u32 %v478_v61, %v477_v60  ;;  %v481_v9 = vrot.slane %v477_v60, 4  ;;  %v561_v10 = vor.u32 %v559_v63, %v558_v62  ;;  %v562_v11 = vrot.slane %v558_v62, 4  ;;  %v419_v12 = vpop.f32.mrb[5].mxu0  ;;  %v435_v13 = vpop.f32.mrb[5].mxu1  ;;  %v792_v61 = vld [vmem:[%s1330_s20 + $0x2c] sm:$0x1] }
 0x178   : > { %v485_v14 = vrot.slane %v483_v2, 7  ;;  %v566_v15 = vrot.slane %v564_v4, 7  ;;  %v508_v16 = vadd.f32 %v459_v39, %v417_v6  ;;  %v586_v17 = vadd.f32 %v459_v39, %v433_v7  ;;  %v420_v18 = vpop.f32.mrb[6].mxu0  ;;  %v436_v19 = vpop.f32.mrb[6].mxu1 }
 0x179   : > { %v498_v20 = vsel %vm1350_vm8, %v480_v8, %v497_v57  ;;  %v576_v21 = vsel %vm1350_vm8, %v561_v10, %v780_v0  ;;  %v509_v26 = vadd.f32 %v461_v42, %v420_v18  ;;  %v587_v27 = vadd.f32 %v461_v42, %v436_v19  ;;  %v422_v28 = vpop.f32.mrb[7].mxu0  ;;  %v438_v29 = vpop.f32.mrb[7].mxu1 }
 0x17a   : > { %499 = vst [vmem:[%s1330_s20] sm:$0xf] %v498_v20  ;;  %781 = vst [vmem:[%s1330_s20 + $0x18] sm:$0xf] %v576_v21  ;;  %v488_v30 = vor.u32 %v486_v3, %v485_v14  ;;  %v490_v31 = vrot.slane %v485_v14, 4  ;;  %v569_v32 = vor.u32 %v567_v5, %v566_v15  ;;  %v571_v33 = vrot.slane %v566_v15, 4 }
 0x17b   : > { %v803_v34 = vpack.c.bf16 %v508_v16, %v508_v16  ;;  %v807_v35 = vpack.c.bf16 %v586_v17, %v586_v17  ;;  %v804_v36 = vpack.c.bf16 %v509_v26, %v509_v26  ;;  %v808_v37 = vpack.c.bf16 %v587_v27, %v587_v27 }
 0x17c   : > { %v489_v38 = vsel %vm1360_vm9, %v481_v9, %v488_v30  ;;  %v502_v39 = vsel %vm1326_vm3, %v490_v31, %v501_v24  ;;  %v570_v40 = vsel %vm1360_vm9, %v562_v11, %v569_v32  ;;  %v580_v41 = vsel %vm1326_vm3, %v571_v33, %v783_v25 }
 0x17d   : > { %500 = vst [vmem:[%s1330_s20 + $0x4] sm:$0xf] %v489_v38  ;;  %503 = vst [vmem:[%s1330_s20 + $0x8] sm:$0x1] %v502_v39  ;;  %v517_v42 = vshrl.u32 %v803_v34, 16  ;;  %v595_v43 = vshrl.u32 %v807_v35, 16 }
 0x17e   : > { %782 = vst [vmem:[%s1330_s20 + $0x1c] sm:$0xf] %v570_v40  ;;  %784 = vst [vmem:[%s1330_s20 + $0x20] sm:$0x1] %v580_v41  ;;  %v525_v46 = vshrl.u32 %v804_v36, 16  ;;  %v603_v47 = vshrl.u32 %v808_v37, 16 }
 0x17f   : > { %v519_v48 = vrot.slane %v517_v42, 7  ;;  %v520_v49 = vshll.u32 %v803_v34, 16  ;;  %v597_v50 = vrot.slane %v595_v43, 7  ;;  %v598_v51 = vshll.u32 %v807_v35, 16 }
 0x180   : > { %v527_v52 = vrot.slane %v525_v46, 7  ;;  %v528_v53 = vshll.u32 %v804_v36, 16  ;;  %v605_v55 = vrot.slane %v603_v47, 7  ;;  %v606_v56 = vshll.u32 %v808_v37, 16 }
 0x181   : > { %v522_v57 = vor.u32 %v520_v49, %v519_v48  ;;  %v523_v58 = vrot.slane %v519_v48, 4  ;;  %v600_v59 = vor.u32 %v598_v51, %v597_v50  ;;  %v601_v60 = vrot.slane %v597_v50, 4 }
 0x182   : > { %v530_v62 = vor.u32 %v528_v53, %v527_v52  ;;  %v532_v63 = vrot.slane %v527_v52, 4  ;;  %v608_v0 = vor.u32 %v606_v56, %v605_v55  ;;  %v610_v2 = vrot.slane %v605_v55, 4 }
 0x183   : > { %v537_v3 = vsel %vm1350_vm8, %v522_v57, %v771_v44  ;;  %v615_v4 = vsel %vm1350_vm8, %v600_v59, %v789_v45 }
 0x184   : > { %772 = vst [vmem:[%s1330_s20 + $0xc] sm:$0xf] %v537_v3  ;;  %790 = vst [vmem:[%s1330_s20 + $0x24] sm:$0xf] %v615_v4  ;;  %v531_v5 = vsel %vm1360_vm9, %v523_v58, %v530_v62  ;;  %v541_v6 = vsel %vm1326_vm3, %v532_v63, %v774_v54  ;;  %v609_v7 = vsel %vm1360_vm9, %v601_v60, %v608_v0 }
 0x185   : > { %v619_v8 = vsel %vm1326_vm3, %v610_v2, %v792_v61  ;;  %773 = vst [vmem:[%s1330_s20 + $0x10] sm:$0xf] %v531_v5  ;;  %775 = vst [vmem:[%s1330_s20 + $0x14] sm:$0x1] %v541_v6 }
 0x186   : > { %791 = vst [vmem:[%s1330_s20 + $0x28] sm:$0xf] %v609_v7  ;;  %793 = vst [vmem:[%s1330_s20 + $0x2c] sm:$0x1] %v619_v8 }
 0x187   : > { %1036 = shalt.err (!%p1033_p2)
}
 0x188   : > { %s1037_s7 = scalar_lea.hbm %s1389_s27, 768  ;;  %s1041_s22 = scalar_lea.hbm %s1456_s3, 1536 }
 0x189   : > { %p1038_p13 = scmp.ne.s32.totalorder %s1389_s27, %s1037_s7  ;;  %p1042_p4 = scmp.lt.u32.totalorder %s1389_s27, %s1456_s3 }
 0x18a   : > { %p1043_p5 = scmp.lt.u32.totalorder %s1041_s22, %s1037_s7  ;;  %p1045_p11 = scmp.lt.u32.totalorder %s1037_s7, %s1389_s27 }
 0x18b   : > { %p1039_p6 = pnand %p1038_p13, %p1476_p0 }
 0x18c   : > { %p1044_p8 = por %p1043_p5, %p1042_p4 }
 0x18d   : > { %p1040_p10 = pneg %p1039_p6 }
 0x18e   : > { %p1046_p1 = por %p1045_p11, %p1044_p8 }
 0x190   : > { %p1047_p3 = pnand %p1046_p1, %p1040_p10 }
 0x192   : > { %1050 = shalt.err (!%p1047_p3)
}
 0x193   : > { %s1104_s18 = smov 64   ;;  %s1105_s20 = smov 4  }
 0x194   : > { %849 = dma.vmem_to_hbm [thread:$0]  (%p1476_p0), %s1391_s24, 768, %s1389_s27, %s622_s23, %s1104_s18, %s1104_s18, %s1105_s20  }
 0x195 PF: > { %s651_s17 = sand.u32 1, %s1081_s12   ;;  %p1477_p7 = scmp.ne.s32.totalorder %s1461_s19, 0 }
 0x196   : > { %p1478_p9 = scmp.ge.s32.totalorder %s1093_s15, 2  ;;  %s652_s16 = scalar_lea.sflag [#allocation4], %s651_s17 }
 0x198   : > { %p863_p12 = pnand %p1478_p9, %p1477_p7 }
 0x19a   : > { %1076 = dma.done.wait (!%p863_p12), %s652_s16, 768  }
 0x19b   : > { %1078 = vsyncadd (!%p863_p12), %s652_s16, 4294966528  ;;  %p17_p2 = scmp.ge.s32.totalorder %s1236_s4, 4   ;;  %s1479_s12 = smov %s1085_s13 }
 0x19c   : > { %s1480_s13 = smov %s1089_s14  ;;  %s1481_s14 = smov %s1252_s9 }
 0x19d   : > { %s1482_s15 = smov %s1236_s4  ;;  %19 = sbr.rel (!%p17_p2) target bundleno = 6 (0x6), region = 88 }
 0x1a4   :  { %657 = vsyncpa [#allocation3], 1 }
 0x1a5   :  { %659 = vsyncpa [#allocation3 + $0x1], 1 }
 0x1a6   :  { %660 = vsyncpa [#allocation6], 1 }
 0x1a7   :  { %661 = vsyncpa [#allocation4], 1 }
 0x1a8   :  { %663 = vsyncpa [#allocation4 + $0x1], 1 }

</bundles_post_ra>
